<compile_context>
chip_gen: v5e
topology: v5e:2x2
jax: 0.10.0
libtpu: 0.0.40
codegen_flags: <defaults>
</compile_context>

<pallas_src>
import functools
import math

import jax
import jax.numpy as jnp
from jax import lax
from jax.experimental import pallas as pl
from jax.experimental.pallas import tpu as pltpu

NEG_SLOPE = 0.01   # nn.LeakyReLU default negative_slope

# Tracks whether pipeline_mode=pl.Buffered(1) (single-buffered resident
# weights) is supported by the installed JAX; flipped off on first failure.
_SINGLE_BUFFER_OK = [True]


def _leaky_relu(x):
    return jnp.where(x > 0, x, NEG_SLOPE * x)


def _softplus(x):
    # matches torch.nn.functional.softplus (beta=1, threshold=20)
    return jnp.where(x > 20.0, x, jnp.log1p(jnp.exp(jnp.minimum(x, 20.0))))


def _round_up(x, m):
    return ((x + m - 1) // m) * m


def mog_kernel(x_ref, w1_ref, b1_ref, w2_ref, b2_ref, w3_ref, b3_ref, out_ref, *, ng):
    """Fused MoG forward for one batch tile.

    out_ref: (2, tile_b, out_w) f32, out_w = round_up(3*ng, 128)
      [0] raw value_output logits   [1] [means | sigmas | alphas]
    Columns >= 3*ng are zero padding (zero weights/bias) and are sliced away
    by the wrapper.
    """
    out_w = w3_ref.shape[1]
    # MXU operand dtype follows the stored weight dtype (f32 default = torch
    # parity; bf16 = native MXU path on v6e/v7x).  Accumulation / VPU / EUP
    # math stays f32.
    mxu_dtype = w1_ref.dtype

    x = x_ref[...].astype(mxu_dtype)

    h = jnp.dot(x, w1_ref[...], preferred_element_type=jnp.float32)
    h = _leaky_relu(h + b1_ref[...].astype(jnp.float32))

    h = jnp.dot(h.astype(mxu_dtype), w2_ref[...], preferred_element_type=jnp.float32)
    h = _leaky_relu(h + b2_ref[...].astype(jnp.float32))

    v = jnp.dot(h.astype(mxu_dtype), w3_ref[...], preferred_element_type=jnp.float32)
    v = v + b3_ref[...].astype(jnp.float32)                     # (tb, out_w)

    # Column-local post-processing.  Masks are a single (1, out_w) iota row
    # that broadcasts inside the where's (no full-tile iota / compares).
    col = lax.broadcasted_iota(jnp.int32, (1, out_w), 1)
    is_sigma = jnp.logical_and(col >= ng, col < 2 * ng)
    is_alpha = jnp.logical_and(col >= 2 * ng, col < 3 * ng)

    sigmas_full = _softplus(v) + 1e-6

    # Masked, numerically-stable softmax over the alpha columns only.
    alpha_logits = jnp.where(is_alpha, v, -jnp.inf)
    a_max = jnp.max(alpha_logits, axis=-1, keepdims=True)
    e = jnp.exp(alpha_logits - a_max)                 # exactly 0 outside alpha cols
    denom = jnp.sum(e, axis=-1, keepdims=True)
    alphas_full = jnp.maximum(e / denom, 1e-6)        # exact divide; clamp(softmax,1e-6)

    processed = jnp.where(is_sigma, sigmas_full, v)
    processed = jnp.where(is_alpha, alphas_full, processed)

    out_ref[0] = v
    out_ref[1] = processed


@functools.partial(
    jax.jit, static_argnames=("ng", "tb", "n_tiles", "single_buffer_weights"))
def _mog_fused(obs2d, w1, b1, w2, b2, w3, b3, *, ng, tb, n_tiles,
               single_buffer_weights):
    """obs2d is already padded to (n_tiles*tb, obs_dim); w3/b3 already padded
    to out_w = round_up(3*ng, 128) columns."""
    batch_pad, obs_dim = obs2d.shape
    hidden = w1.shape[1]
    out_w = w3.shape[1]

    use_single = bool(single_buffer_weights) and hasattr(pl, "Buffered")
    rep = lambda i: (0, 0)       # weights/biases stay VMEM-resident across tiles
    wkw = dict(pipeline_mode=pl.Buffered(1)) if use_single else {}

    def rep_spec(shape):
        return pl.BlockSpec(shape, rep, **wkw)

    # Explicit VMEM budget: weights (single- or double-buffered) + pipelined
    # input/output tiles + headroom for intermediates.  Covers v5e's 16 MiB
    # scoped default; never asks for more than is sane on v7x (64 MiB phys).
    bpe = lambda a: a.size * a.dtype.itemsize
    weight_bufs = 1 if use_single else 2
    need = (weight_bufs * (bpe(w1) + bpe(b1) + bpe(w2) + bpe(b2) + bpe(w3) + bpe(b3))
            + 2 * tb * obs_dim * obs2d.dtype.itemsize     # double-buffered input tile
            + 2 * 2 * tb * out_w * 4                      # double-buffered output slab
            + 6 * tb * max(hidden, out_w) * 4)            # intermediate headroom
    vmem_limit = int(min(100 << 20, max(32 << 20, int(need * 1.25))))

    return pl.pallas_call(
        functools.partial(mog_kernel, ng=ng),
        out_shape=jax.ShapeDtypeStruct((2, batch_pad, out_w), jnp.float32),
        grid=(n_tiles,),
        in_specs=[
            pl.BlockSpec((tb, obs_dim), lambda i: (i, 0)),
            rep_spec((obs_dim, hidden)),
            rep_spec((1, hidden)),
            rep_spec((hidden, hidden)),
            rep_spec((1, hidden)),
            rep_spec((hidden, out_w)),
            rep_spec((1, out_w)),
        ],
        out_specs=pl.BlockSpec((2, tb, out_w), lambda i: (0, i, 0)),
        compiler_params=pltpu.CompilerParams(
            dimension_semantics=("parallel",),   # batch tiles shard over v7x's 2 TCs
            vmem_limit_bytes=vmem_limit),
    )(obs2d, w1, b1, w2, b2, w3, b3)


def mog_forward(obs, params, num_gaussians, block_batch=1024):
    """Pallas MOG.forward hot path.

    Returns (value_output, means, sigmas, alphas, value); the torch module's
    forward returns (value_output, state) and stashes means/sigmas/alphas,
    value_function() computes `value`.
    """
    w1, b1, w2, b2, w3, b3 = params
    ng = num_gaussians
    assert w3.shape[1] == 3 * ng

    batch = obs.shape[0]
    obs2d = obs.reshape(batch, -1)
    if w1.dtype == jnp.float32:
        # parity with torch `.float()`; for bf16 params the cast to the MXU
        # dtype happens inside the kernel instead (no wrapper-side cast).
        obs2d = obs2d.astype(jnp.float32)
    obs_dim = obs2d.shape[1]

    # Adaptive batch tiling: at most `block_batch` rows per tile, padding kept
    # small, and >=2 tiles once there are enough rows so v7x's second
    # TensorCore isn't idle (harmless on 1-TC v5e/v6e).
    n_tiles = max(1, -(-batch // block_batch))
    if n_tiles == 1 and batch >= 16:
        n_tiles = 2
    tb = _round_up(-(-batch // n_tiles), 8)
    batch_pad = tb * n_tiles
    if batch_pad != batch:
        obs2d = jnp.pad(obs2d, ((0, batch_pad - batch), (0, 0)))

    # Lane-dense output: pad the output layer to a multiple of 128 columns
    # (zero weights/bias) so the writeback DMA is dense and every store is a
    # full tile.
    out_w = _round_up(3 * ng, 128)
    if out_w != 3 * ng:
        w3p = jnp.pad(w3, ((0, 0), (0, out_w - 3 * ng)))
        b3p = jnp.pad(b3, ((0, 0), (0, out_w - 3 * ng)))
    else:
        w3p, b3p = w3, b3

    fused = None
    if _SINGLE_BUFFER_OK[0]:
        try:
            fused = _mog_fused(obs2d, w1, b1, w2, b2, w3p, b3p,
                               ng=ng, tb=tb, n_tiles=n_tiles,
                               single_buffer_weights=True)
        except Exception:
            _SINGLE_BUFFER_OK[0] = False   # fall back to default double-buffering
    if fused is None:
        fused = _mog_fused(obs2d, w1, b1, w2, b2, w3p, b3p,
                           ng=ng, tb=tb, n_tiles=n_tiles,
                           single_buffer_weights=False)

    value_output = fused[0, :batch, :3 * ng]
    processed = fused[1, :batch, :]
    means = processed[:, :ng]
    sigmas = processed[:, ng:2 * ng]
    alphas = processed[:, 2 * ng:3 * ng]
    value = value_function(means, alphas)   # tiny XLA reduce; replaces the old plane-2
    return value_output, means, sigmas, alphas, value


def value_function(means, alphas):
    # torch: torch.sum(means * alphas, dim=1)
    return jnp.sum(means * alphas, axis=1)


def init_params(key, obs_dim, hidden, num_gaussians, dtype=jnp.float32):
    """nn.Linear default init (uniform +/- 1/sqrt(fan_in)); weights stored (in, out).

    dtype=jnp.bfloat16 is recommended on v6e/v7x (native bf16 MXU, half the
    weight HBM bytes); the default f32 keeps exact parity with the torch module.
    """
    def linear(k, fan_in, fan_out):
        k_w, k_b = jax.random.split(k)
        bound = 1.0 / math.sqrt(fan_in)
        w = jax.random.uniform(k_w, (fan_in, fan_out), jnp.float32, -bound, bound)
        b = jax.random.uniform(k_b, (1, fan_out), jnp.float32, -bound, bound)
        return w.astype(dtype), b.astype(dtype)

    k1, k2, k3 = jax.random.split(key, 3)
    w1, b1 = linear(k1, obs_dim, hidden)
    w2, b2 = linear(k2, hidden, hidden)
    w3, b3 = linear(k3, hidden, 3 * num_gaussians)
    return (w1, b1, w2, b2, w3, b3)


def _reference(obs, params, ng):
    """Pure-JAX reference of the torch module's forward (+ value_function)."""
    w1, b1, w2, b2, w3, b3 = params
    f32 = jnp.float32
    x = obs.reshape(obs.shape[0], -1).astype(f32)
    h = _leaky_relu(x @ w1.astype(f32) + b1.astype(f32))
    h = _leaky_relu(h @ w2.astype(f32) + b2.astype(f32))
    v = h @ w3.astype(f32) + b3.astype(f32)
    m = v[:, :ng]
    s = _softplus(v[:, ng:2 * ng]) + 1e-6
    a = jnp.maximum(jax.nn.softmax(v[:, 2 * ng:], axis=-1), 1e-6)
    val = jnp.sum(m * a, axis=1)
    return v, m, s, a, val


if __name__ == "__main__":
    key = jax.random.PRNGKey(0)
    k_obs, k_params, k_obs2 = jax.random.split(key, 3)

    obs_dim = 16          # obs_space.shape[0]
    hidden = 32           # hidden_layer_dims
    num_gaussians = 4     # -> output layer dim 12
    # num_layers = 2 (two hidden Linear+LeakyReLU layers), activation=LeakyReLU

    params = init_params(k_params, obs_dim, hidden, num_gaussians)  # f32 parity

    # generous tolerance for MXU vs XLA matmul path differences
    tol = dict(rtol=5e-2, atol=5e-3)

    def check(batch, key_obs):
        obs = jax.random.normal(key_obs, (batch, obs_dim), jnp.float32)
        out = mog_forward(obs, params, num_gaussians)
        jax.block_until_ready(out)
        value_output, means, sigmas, alphas, value = out
        v_ref, m_ref, s_ref, a_ref, val_ref = _reference(obs, params, num_gaussians)

        assert value_output.shape == (batch, 3 * num_gaussians)
        assert means.shape == sigmas.shape == alphas.shape == (batch, num_gaussians)
        assert value.shape == (batch,)

        assert bool(jnp.allclose(value_output, v_ref, **tol))
        assert bool(jnp.allclose(means, m_ref, **tol))
        assert bool(jnp.allclose(sigmas, s_ref, **tol))
        assert bool(jnp.allclose(alphas, a_ref, **tol))
        assert bool(jnp.allclose(value, val_ref, **tol))

        # sanity: sigmas positive, alphas clamped and ~normalized, value consistent
        assert bool(jnp.all(sigmas > 0))
        assert bool(jnp.all(alphas >= 1e-6))
        assert bool(jnp.allclose(jnp.sum(alphas, axis=-1), 1.0, atol=5e-3))
        assert bool(jnp.allclose(value, value_function(means, alphas),
                                 rtol=1e-4, atol=1e-5))

    check(8, k_obs)       # single batch tile (8 rows)
    check(40, k_obs2)     # multi-tile path: 2 tiles of 24 rows + row padding

    # bf16 weight path (production config on v6e/v7x): smoke test, loose checks.
    params_bf16 = init_params(k_params, obs_dim, hidden, num_gaussians,
                              dtype=jnp.bfloat16)
    obs = jax.random.normal(k_obs, (8, obs_dim), jnp.float32)
    vo, m, s, a, val = mog_forward(obs, params_bf16, num_gaussians)
    jax.block_until_ready((vo, m, s, a, val))
    assert bool(jnp.all(jnp.isfinite(vo)))
    assert bool(jnp.all(s > 0))
    assert bool(jnp.allclose(jnp.sum(a, axis=-1), 1.0, atol=2e-2))

    # TODO(synk): custom_loss / compute_log_likelihood / predict_gmm_params are
    # training-time helpers outside the module's forward; not fused here.
    print("KERNEL_OK")
</pallas_src>

<mosaic_0001>
module attributes {stable_mosaic.version = 11 : i64} {
  func.func @mog_kernel(%arg0: i32, %arg1: memref<8x16xf32, #tpu.memory_space<vmem>>, %arg2: memref<16x32xf32, #tpu.memory_space<vmem>>, %arg3: memref<1x32xf32, #tpu.memory_space<vmem>>, %arg4: memref<32x32xf32, #tpu.memory_space<vmem>>, %arg5: memref<1x32xf32, #tpu.memory_space<vmem>>, %arg6: memref<32x128xf32, #tpu.memory_space<vmem>>, %arg7: memref<1x128xf32, #tpu.memory_space<vmem>>, %arg8: memref<2x8x128xf32, #tpu.memory_space<vmem>>) attributes {dimension_semantics = [#tpu.dimension_semantics<parallel>], iteration_bounds = array<i64: 1>, scalar_prefetch = 0 : i64, scratch_operands = 0 : i64, tpu.core_type = #tpu.core_type<tc>, window_params = [{transform_indices = @transform_0, window_bounds = array<i64: 8, 16>}, {pipeline_mode = #tpu.pipeline_mode<synchronous>, transform_indices = @transform_1, window_bounds = array<i64: 16, 32>}, {pipeline_mode = #tpu.pipeline_mode<synchronous>, transform_indices = @transform_2, window_bounds = array<i64: 1, 32>}, {pipeline_mode = #tpu.pipeline_mode<synchronous>, transform_indices = @transform_3, window_bounds = array<i64: 32, 32>}, {pipeline_mode = #tpu.pipeline_mode<synchronous>, transform_indices = @transform_4, window_bounds = array<i64: 1, 32>}, {pipeline_mode = #tpu.pipeline_mode<synchronous>, transform_indices = @transform_5, window_bounds = array<i64: 32, 128>}, {pipeline_mode = #tpu.pipeline_mode<synchronous>, transform_indices = @transform_6, window_bounds = array<i64: 1, 128>}, {transform_indices = @transform_7, window_bounds = array<i64: 2, 8, 128>}]} {
    %c0 = arith.constant 0 : index
    %c0_0 = arith.constant 0 : index
    %0 = vector.load %arg1[%c0, %c0_0] : memref<8x16xf32, #tpu.memory_space<vmem>>, vector<8x16xf32>
    %c0_1 = arith.constant 0 : index
    %c0_2 = arith.constant 0 : index
    %1 = vector.load %arg2[%c0_1, %c0_2] : memref<16x32xf32, #tpu.memory_space<vmem>>, vector<16x32xf32>
    %cst = arith.constant dense<0.000000e+00> : vector<8x32xf32>
    %2 = tpu.matmul %0, %1, %cst {dimension_numbers = #tpu.dot_dimension_numbers<[1], [0], [0], [1], [0, 0, 1, 1], [], []>} : vector<8x16xf32>, vector<16x32xf32>, vector<8x32xf32> -> vector<8x32xf32>
    %c0_3 = arith.constant 0 : index
    %c0_4 = arith.constant 0 : index
    %3 = vector.load %arg3[%c0_3, %c0_4] : memref<1x32xf32, #tpu.memory_space<vmem>>, vector<1x32xf32>
    %4 = vector.broadcast %3 : vector<1x32xf32> to vector<8x32xf32>
    %5 = arith.addf %2, %4 : vector<8x32xf32>
    %cst_5 = arith.constant 0.000000e+00 : f32
    %6 = vector.broadcast %cst_5 : f32 to vector<8x32xf32>
    %7 = arith.cmpf ogt, %5, %6 : vector<8x32xf32>
    %cst_6 = arith.constant 0.00999999977 : f32
    %8 = vector.broadcast %cst_6 : f32 to vector<8x32xf32>
    %9 = arith.mulf %8, %5 : vector<8x32xf32>
    %10 = arith.select %7, %5, %9 : vector<8x32xi1>, vector<8x32xf32>
    %c0_7 = arith.constant 0 : index
    %c0_8 = arith.constant 0 : index
    %11 = vector.load %arg4[%c0_7, %c0_8] : memref<32x32xf32, #tpu.memory_space<vmem>>, vector<32x32xf32>
    %cst_9 = arith.constant dense<0.000000e+00> : vector<8x32xf32>
    %12 = tpu.matmul %10, %11, %cst_9 {dimension_numbers = #tpu.dot_dimension_numbers<[1], [0], [0], [1], [0, 0, 1, 1], [], []>} : vector<8x32xf32>, vector<32x32xf32>, vector<8x32xf32> -> vector<8x32xf32>
    %c0_10 = arith.constant 0 : index
    %c0_11 = arith.constant 0 : index
    %13 = vector.load %arg5[%c0_10, %c0_11] : memref<1x32xf32, #tpu.memory_space<vmem>>, vector<1x32xf32>
    %14 = vector.broadcast %13 : vector<1x32xf32> to vector<8x32xf32>
    %15 = arith.addf %12, %14 : vector<8x32xf32>
    %cst_12 = arith.constant 0.000000e+00 : f32
    %16 = vector.broadcast %cst_12 : f32 to vector<8x32xf32>
    %17 = arith.cmpf ogt, %15, %16 : vector<8x32xf32>
    %cst_13 = arith.constant 0.00999999977 : f32
    %18 = vector.broadcast %cst_13 : f32 to vector<8x32xf32>
    %19 = arith.mulf %18, %15 : vector<8x32xf32>
    %20 = arith.select %17, %15, %19 : vector<8x32xi1>, vector<8x32xf32>
    %c0_14 = arith.constant 0 : index
    %c0_15 = arith.constant 0 : index
    %21 = vector.load %arg6[%c0_14, %c0_15] : memref<32x128xf32, #tpu.memory_space<vmem>>, vector<32x128xf32>
    %cst_16 = arith.constant dense<0.000000e+00> : vector<8x128xf32>
    %22 = tpu.matmul %20, %21, %cst_16 {dimension_numbers = #tpu.dot_dimension_numbers<[1], [0], [0], [1], [0, 0, 1, 1], [], []>} : vector<8x32xf32>, vector<32x128xf32>, vector<8x128xf32> -> vector<8x128xf32>
    %c0_17 = arith.constant 0 : index
    %c0_18 = arith.constant 0 : index
    %23 = vector.load %arg7[%c0_17, %c0_18] : memref<1x128xf32, #tpu.memory_space<vmem>>, vector<1x128xf32>
    %24 = vector.broadcast %23 : vector<1x128xf32> to vector<8x128xf32>
    %25 = arith.addf %22, %24 : vector<8x128xf32>
    %26 = tpu.iota {dimensions = array<i32: 1>} : vector<1x128xi32>
    %c4_i32 = arith.constant 4 : i32
    %27 = vector.broadcast %c4_i32 : i32 to vector<1x128xi32>
    %28 = arith.cmpi sge, %26, %27 : vector<1x128xi32>
    %c8_i32 = arith.constant 8 : i32
    %29 = vector.broadcast %c8_i32 : i32 to vector<1x128xi32>
    %30 = arith.cmpi slt, %26, %29 : vector<1x128xi32>
    %31 = arith.andi %28, %30 : vector<1x128xi1>
    %c8_i32_19 = arith.constant 8 : i32
    %32 = vector.broadcast %c8_i32_19 : i32 to vector<1x128xi32>
    %33 = arith.cmpi sge, %26, %32 : vector<1x128xi32>
    %c12_i32 = arith.constant 12 : i32
    %34 = vector.broadcast %c12_i32 : i32 to vector<1x128xi32>
    %35 = arith.cmpi slt, %26, %34 : vector<1x128xi32>
    %36 = arith.andi %33, %35 : vector<1x128xi1>
    %cst_20 = arith.constant 2.000000e+01 : f32
    %37 = vector.broadcast %cst_20 : f32 to vector<8x128xf32>
    %38 = arith.cmpf ogt, %25, %37 : vector<8x128xf32>
    %cst_21 = arith.constant 2.000000e+01 : f32
    %39 = vector.broadcast %cst_21 : f32 to vector<8x128xf32>
    %40 = arith.minimumf %25, %39 : vector<8x128xf32>
    %41 = math.exp %40 : vector<8x128xf32>
    %42 = math.log1p %41 : vector<8x128xf32>
    %43 = arith.select %38, %25, %42 : vector<8x128xi1>, vector<8x128xf32>
    %cst_22 = arith.constant 9.99999997E-7 : f32
    %44 = vector.broadcast %cst_22 : f32 to vector<8x128xf32>
    %45 = arith.addf %43, %44 : vector<8x128xf32>
    %cst_23 = arith.constant 0xFF800000 : f32
    %46 = vector.shape_cast %36 : vector<1x128xi1> to vector<1x128xi1>
    %47 = vector.broadcast %46 : vector<1x128xi1> to vector<8x128xi1>
    %48 = vector.broadcast %cst_23 : f32 to vector<8x128xf32>
    %49 = arith.select %47, %25, %48 : vector<8x128xi1>, vector<8x128xf32>
    %cst_24 = arith.constant dense<0xFF800000> : vector<8xf32>
    %50 = vector.multi_reduction <maximumf>, %49, %cst_24 [1] : vector<8x128xf32> to vector<8xf32>
    %51 = vector.shape_cast %50 : vector<8xf32> to vector<8x1xf32>
    %52 = vector.broadcast %51 : vector<8x1xf32> to vector<8x128xf32>
    %53 = arith.subf %49, %52 : vector<8x128xf32>
    %54 = math.exp %53 : vector<8x128xf32>
    %cst_25 = arith.constant dense<0.000000e+00> : vector<8xf32>
    %55 = vector.multi_reduction <add>, %54, %cst_25 [1] : vector<8x128xf32> to vector<8xf32>
    %56 = vector.shape_cast %55 : vector<8xf32> to vector<8x1xf32>
    %57 = vector.broadcast %56 : vector<8x1xf32> to vector<8x128xf32>
    %58 = arith.divf %54, %57 : vector<8x128xf32>
    %cst_26 = arith.constant 9.99999997E-7 : f32
    %59 = vector.broadcast %cst_26 : f32 to vector<8x128xf32>
    %60 = arith.maximumf %58, %59 : vector<8x128xf32>
    %61 = vector.shape_cast %31 : vector<1x128xi1> to vector<1x128xi1>
    %62 = vector.broadcast %61 : vector<1x128xi1> to vector<8x128xi1>
    %63 = arith.select %62, %45, %25 : vector<8x128xi1>, vector<8x128xf32>
    %64 = vector.shape_cast %36 : vector<1x128xi1> to vector<1x128xi1>
    %65 = vector.broadcast %64 : vector<1x128xi1> to vector<8x128xi1>
    %66 = arith.select %65, %60, %63 : vector<8x128xi1>, vector<8x128xf32>
    %c0_27 = arith.constant 0 : index
    %c0_28 = arith.constant 0 : index
    %c0_29 = arith.constant 0 : index
    %67 = vector.load %arg8[%c0_27, %c0_28, %c0_29] : memref<2x8x128xf32, #tpu.memory_space<vmem>>, vector<1x8x128xf32>
    %68 = vector.shape_cast %67 : vector<1x8x128xf32> to vector<8x128xf32>
    %69 = vector.shape_cast %25 : vector<8x128xf32> to vector<1x8x128xf32>
    tpu.vector_store %arg8[%c0_27, %c0_28, %c0_29], %69 {strides = array<i32>} : memref<2x8x128xf32, #tpu.memory_space<vmem>>, vector<1x8x128xf32>,
    %c1 = arith.constant 1 : index
    %c0_30 = arith.constant 0 : index
    %c0_31 = arith.constant 0 : index
    %70 = vector.load %arg8[%c1, %c0_30, %c0_31] : memref<2x8x128xf32, #tpu.memory_space<vmem>>, vector<1x8x128xf32>
    %71 = vector.shape_cast %70 : vector<1x8x128xf32> to vector<8x128xf32>
    %72 = vector.shape_cast %66 : vector<8x128xf32> to vector<1x8x128xf32>
    tpu.vector_store %arg8[%c1, %c0_30, %c0_31], %72 {strides = array<i32>} : memref<2x8x128xf32, #tpu.memory_space<vmem>>, vector<1x8x128xf32>,
    return
  }
  func.func @transform_0(%arg0: i32) -> (i32, i32) {
    %c0_i32 = arith.constant 0 : i32
    %c0_i32_0 = arith.constant 0 : i32
    return %arg0, %c0_i32 : i32, i32
  }
  func.func @transform_1(%arg0: i32) -> (i32, i32) {
    %c0_i32 = arith.constant 0 : i32
    %c0_i32_0 = arith.constant 0 : i32
    %c0_i32_1 = arith.constant 0 : i32
    return %c0_i32, %c0_i32_0 : i32, i32
  }
  func.func @transform_2(%arg0: i32) -> (i32, i32) {
    %c0_i32 = arith.constant 0 : i32
    %c0_i32_0 = arith.constant 0 : i32
    %c0_i32_1 = arith.constant 0 : i32
    return %c0_i32, %c0_i32_0 : i32, i32
  }
  func.func @transform_3(%arg0: i32) -> (i32, i32) {
    %c0_i32 = arith.constant 0 : i32
    %c0_i32_0 = arith.constant 0 : i32
    %c0_i32_1 = arith.constant 0 : i32
    return %c0_i32, %c0_i32_0 : i32, i32
  }
  func.func @transform_4(%arg0: i32) -> (i32, i32) {
    %c0_i32 = arith.constant 0 : i32
    %c0_i32_0 = arith.constant 0 : i32
    %c0_i32_1 = arith.constant 0 : i32
    return %c0_i32, %c0_i32_0 : i32, i32
  }
  func.func @transform_5(%arg0: i32) -> (i32, i32) {
    %c0_i32 = arith.constant 0 : i32
    %c0_i32_0 = arith.constant 0 : i32
    %c0_i32_1 = arith.constant 0 : i32
    return %c0_i32, %c0_i32_0 : i32, i32
  }
  func.func @transform_6(%arg0: i32) -> (i32, i32) {
    %c0_i32 = arith.constant 0 : i32
    %c0_i32_0 = arith.constant 0 : i32
    %c0_i32_1 = arith.constant 0 : i32
    return %c0_i32, %c0_i32_0 : i32, i32
  }
  func.func @transform_7(%arg0: i32) -> (i32, i32, i32) {
    %c0_i32 = arith.constant 0 : i32
    %c0_i32_0 = arith.constant 0 : i32
    %c0_i32_1 = arith.constant 0 : i32
    return %c0_i32, %arg0, %c0_i32_0 : i32, i32, i32
  }
}

module attributes {stable_mosaic.version = 11 : i64} {
  func.func @mog_kernel(%arg0: i32, %arg1: memref<8x16xf32, #tpu.memory_space<vmem>>, %arg2: memref<16x32xf32, #tpu.memory_space<vmem>>, %arg3: memref<1x32xf32, #tpu.memory_space<vmem>>, %arg4: memref<32x32xf32, #tpu.memory_space<vmem>>, %arg5: memref<1x32xf32, #tpu.memory_space<vmem>>, %arg6: memref<32x128xf32, #tpu.memory_space<vmem>>, %arg7: memref<1x128xf32, #tpu.memory_space<vmem>>, %arg8: memref<2x8x128xf32, #tpu.memory_space<vmem>>) attributes {dimension_semantics = [#tpu.dimension_semantics<parallel>], iteration_bounds = array<i64: 1>, scalar_prefetch = 0 : i64, scratch_operands = 0 : i64, tpu.core_type = #tpu.core_type<tc>, window_params = [{transform_indices = @transform_0, window_bounds = array<i64: 8, 16>}, {pipeline_mode = #tpu.pipeline_mode<synchronous>, transform_indices = @transform_1, window_bounds = array<i64: 16, 32>}, {pipeline_mode = #tpu.pipeline_mode<synchronous>, transform_indices = @transform_2, window_bounds = array<i64: 1, 32>}, {pipeline_mode = #tpu.pipeline_mode<synchronous>, transform_indices = @transform_3, window_bounds = array<i64: 32, 32>}, {pipeline_mode = #tpu.pipeline_mode<synchronous>, transform_indices = @transform_4, window_bounds = array<i64: 1, 32>}, {pipeline_mode = #tpu.pipeline_mode<synchronous>, transform_indices = @transform_5, window_bounds = array<i64: 32, 128>}, {pipeline_mode = #tpu.pipeline_mode<synchronous>, transform_indices = @transform_6, window_bounds = array<i64: 1, 128>}, {transform_indices = @transform_7, window_bounds = array<i64: 2, 8, 128>}]} {
    %c0 = arith.constant 0 : index
    %c0_0 = arith.constant 0 : index
    %0 = vector.load %arg1[%c0, %c0_0] : memref<8x16xf32, #tpu.memory_space<vmem>>, vector<8x16xf32>
    %c0_1 = arith.constant 0 : index
    %c0_2 = arith.constant 0 : index
    %1 = vector.load %arg2[%c0_1, %c0_2] : memref<16x32xf32, #tpu.memory_space<vmem>>, vector<16x32xf32>
    %cst = arith.constant dense<0.000000e+00> : vector<8x32xf32>
    %2 = tpu.matmul %0, %1, %cst {dimension_numbers = #tpu.dot_dimension_numbers<[1], [0], [0], [1], [0, 0, 1, 1], [], []>} : vector<8x16xf32>, vector<16x32xf32>, vector<8x32xf32> -> vector<8x32xf32>
    %c0_3 = arith.constant 0 : index
    %c0_4 = arith.constant 0 : index
    %3 = vector.load %arg3[%c0_3, %c0_4] : memref<1x32xf32, #tpu.memory_space<vmem>>, vector<1x32xf32>
    %4 = vector.broadcast %3 : vector<1x32xf32> to vector<8x32xf32>
    %5 = arith.addf %2, %4 : vector<8x32xf32>
    %cst_5 = arith.constant 0.000000e+00 : f32
    %6 = vector.broadcast %cst_5 : f32 to vector<8x32xf32>
    %7 = arith.cmpf ogt, %5, %6 : vector<8x32xf32>
    %cst_6 = arith.constant 0.00999999977 : f32
    %8 = vector.broadcast %cst_6 : f32 to vector<8x32xf32>
    %9 = arith.mulf %8, %5 : vector<8x32xf32>
    %10 = arith.select %7, %5, %9 : vector<8x32xi1>, vector<8x32xf32>
    %c0_7 = arith.constant 0 : index
    %c0_8 = arith.constant 0 : index
    %11 = vector.load %arg4[%c0_7, %c0_8] : memref<32x32xf32, #tpu.memory_space<vmem>>, vector<32x32xf32>
    %cst_9 = arith.constant dense<0.000000e+00> : vector<8x32xf32>
    %12 = tpu.matmul %10, %11, %cst_9 {dimension_numbers = #tpu.dot_dimension_numbers<[1], [0], [0], [1], [0, 0, 1, 1], [], []>} : vector<8x32xf32>, vector<32x32xf32>, vector<8x32xf32> -> vector<8x32xf32>
    %c0_10 = arith.constant 0 : index
    %c0_11 = arith.constant 0 : index
    %13 = vector.load %arg5[%c0_10, %c0_11] : memref<1x32xf32, #tpu.memory_space<vmem>>, vector<1x32xf32>
    %14 = vector.broadcast %13 : vector<1x32xf32> to vector<8x32xf32>
    %15 = arith.addf %12, %14 : vector<8x32xf32>
    %cst_12 = arith.constant 0.000000e+00 : f32
    %16 = vector.broadcast %cst_12 : f32 to vector<8x32xf32>
    %17 = arith.cmpf ogt, %15, %16 : vector<8x32xf32>
    %cst_13 = arith.constant 0.00999999977 : f32
    %18 = vector.broadcast %cst_13 : f32 to vector<8x32xf32>
    %19 = arith.mulf %18, %15 : vector<8x32xf32>
    %20 = arith.select %17, %15, %19 : vector<8x32xi1>, vector<8x32xf32>
    %c0_14 = arith.constant 0 : index
    %c0_15 = arith.constant 0 : index
    %21 = vector.load %arg6[%c0_14, %c0_15] : memref<32x128xf32, #tpu.memory_space<vmem>>, vector<32x128xf32>
    %cst_16 = arith.constant dense<0.000000e+00> : vector<8x128xf32>
    %22 = tpu.matmul %20, %21, %cst_16 {dimension_numbers = #tpu.dot_dimension_numbers<[1], [0], [0], [1], [0, 0, 1, 1], [], []>} : vector<8x32xf32>, vector<32x128xf32>, vector<8x128xf32> -> vector<8x128xf32>
    %c0_17 = arith.constant 0 : index
    %c0_18 = arith.constant 0 : index
    %23 = vector.load %arg7[%c0_17, %c0_18] : memref<1x128xf32, #tpu.memory_space<vmem>>, vector<1x128xf32>
    %24 = vector.broadcast %23 : vector<1x128xf32> to vector<8x128xf32>
    %25 = arith.addf %22, %24 : vector<8x128xf32>
    %26 = tpu.iota {dimensions = array<i32: 1>} : vector<1x128xi32>
    %c4_i32 = arith.constant 4 : i32
    %27 = vector.broadcast %c4_i32 : i32 to vector<1x128xi32>
    %28 = arith.cmpi sge, %26, %27 : vector<1x128xi32>
    %c8_i32 = arith.constant 8 : i32
    %29 = vector.broadcast %c8_i32 : i32 to vector<1x128xi32>
    %30 = arith.cmpi slt, %26, %29 : vector<1x128xi32>
    %31 = arith.andi %28, %30 : vector<1x128xi1>
    %c8_i32_19 = arith.constant 8 : i32
    %32 = vector.broadcast %c8_i32_19 : i32 to vector<1x128xi32>
    %33 = arith.cmpi sge, %26, %32 : vector<1x128xi32>
    %c12_i32 = arith.constant 12 : i32
    %34 = vector.broadcast %c12_i32 : i32 to vector<1x128xi32>
    %35 = arith.cmpi slt, %26, %34 : vector<1x128xi32>
    %36 = arith.andi %33, %35 : vector<1x128xi1>
    %cst_20 = arith.constant 2.000000e+01 : f32
    %37 = vector.broadcast %cst_20 : f32 to vector<8x128xf32>
    %38 = arith.cmpf ogt, %25, %37 : vector<8x128xf32>
    %cst_21 = arith.constant 2.000000e+01 : f32
    %39 = vector.broadcast %cst_21 : f32 to vector<8x128xf32>
    %40 = arith.minimumf %25, %39 : vector<8x128xf32>
    %41 = math.exp %40 : vector<8x128xf32>
    %42 = math.log1p %41 : vector<8x128xf32>
    %43 = arith.select %38, %25, %42 : vector<8x128xi1>, vector<8x128xf32>
    %cst_22 = arith.constant 9.99999997E-7 : f32
    %44 = vector.broadcast %cst_22 : f32 to vector<8x128xf32>
    %45 = arith.addf %43, %44 : vector<8x128xf32>
    %cst_23 = arith.constant 0xFF800000 : f32
    %46 = vector.shape_cast %36 : vector<1x128xi1> to vector<1x128xi1>
    %47 = vector.broadcast %46 : vector<1x128xi1> to vector<8x128xi1>
    %48 = vector.broadcast %cst_23 : f32 to vector<8x128xf32>
    %49 = arith.select %47, %25, %48 : vector<8x128xi1>, vector<8x128xf32>
    %cst_24 = arith.constant dense<0xFF800000> : vector<8xf32>
    %50 = vector.multi_reduction <maximumf>, %49, %cst_24 [1] : vector<8x128xf32> to vector<8xf32>
    %51 = vector.shape_cast %50 : vector<8xf32> to vector<8x1xf32>
    %52 = vector.broadcast %51 : vector<8x1xf32> to vector<8x128xf32>
    %53 = arith.subf %49, %52 : vector<8x128xf32>
    %54 = math.exp %53 : vector<8x128xf32>
    %cst_25 = arith.constant dense<0.000000e+00> : vector<8xf32>
    %55 = vector.multi_reduction <add>, %54, %cst_25 [1] : vector<8x128xf32> to vector<8xf32>
    %56 = vector.shape_cast %55 : vector<8xf32> to vector<8x1xf32>
    %57 = vector.broadcast %56 : vector<8x1xf32> to vector<8x128xf32>
    %58 = arith.divf %54, %57 : vector<8x128xf32>
    %cst_26 = arith.constant 9.99999997E-7 : f32
    %59 = vector.broadcast %cst_26 : f32 to vector<8x128xf32>
    %60 = arith.maximumf %58, %59 : vector<8x128xf32>
    %61 = vector.shape_cast %31 : vector<1x128xi1> to vector<1x128xi1>
    %62 = vector.broadcast %61 : vector<1x128xi1> to vector<8x128xi1>
    %63 = arith.select %62, %45, %25 : vector<8x128xi1>, vector<8x128xf32>
    %64 = vector.shape_cast %36 : vector<1x128xi1> to vector<1x128xi1>
    %65 = vector.broadcast %64 : vector<1x128xi1> to vector<8x128xi1>
    %66 = arith.select %65, %60, %63 : vector<8x128xi1>, vector<8x128xf32>
    %c0_27 = arith.constant 0 : index
    %c0_28 = arith.constant 0 : index
    %c0_29 = arith.constant 0 : index
    %67 = vector.load %arg8[%c0_27, %c0_28, %c0_29] : memref<2x8x128xf32, #tpu.memory_space<vmem>>, vector<1x8x128xf32>
    %68 = vector.shape_cast %67 : vector<1x8x128xf32> to vector<8x128xf32>
    %69 = vector.shape_cast %25 : vector<8x128xf32> to vector<1x8x128xf32>
    tpu.vector_store %arg8[%c0_27, %c0_28, %c0_29], %69 {strides = array<i32>} : memref<2x8x128xf32, #tpu.memory_space<vmem>>, vector<1x8x128xf32>,
    %c1 = arith.constant 1 : index
    %c0_30 = arith.constant 0 : index
    %c0_31 = arith.constant 0 : index
    %70 = vector.load %arg8[%c1, %c0_30, %c0_31] : memref<2x8x128xf32, #tpu.memory_space<vmem>>, vector<1x8x128xf32>
    %71 = vector.shape_cast %70 : vector<1x8x128xf32> to vector<8x128xf32>
    %72 = vector.shape_cast %66 : vector<8x128xf32> to vector<1x8x128xf32>
    tpu.vector_store %arg8[%c1, %c0_30, %c0_31], %72 {strides = array<i32>} : memref<2x8x128xf32, #tpu.memory_space<vmem>>, vector<1x8x128xf32>,
    return
  }
  func.func @transform_0(%arg0: i32) -> (i32, i32) {
    %c0_i32 = arith.constant 0 : i32
    %c0_i32_0 = arith.constant 0 : i32
    return %arg0, %c0_i32 : i32, i32
  }
  func.func @transform_1(%arg0: i32) -> (i32, i32) {
    %c0_i32 = arith.constant 0 : i32
    %c0_i32_0 = arith.constant 0 : i32
    %c0_i32_1 = arith.constant 0 : i32
    return %c0_i32, %c0_i32_0 : i32, i32
  }
  func.func @transform_2(%arg0: i32) -> (i32, i32) {
    %c0_i32 = arith.constant 0 : i32
    %c0_i32_0 = arith.constant 0 : i32
    %c0_i32_1 = arith.constant 0 : i32
    return %c0_i32, %c0_i32_0 : i32, i32
  }
  func.func @transform_3(%arg0: i32) -> (i32, i32) {
    %c0_i32 = arith.constant 0 : i32
    %c0_i32_0 = arith.constant 0 : i32
    %c0_i32_1 = arith.constant 0 : i32
    return %c0_i32, %c0_i32_0 : i32, i32
  }
  func.func @transform_4(%arg0: i32) -> (i32, i32) {
    %c0_i32 = arith.constant 0 : i32
    %c0_i32_0 = arith.constant 0 : i32
    %c0_i32_1 = arith.constant 0 : i32
    return %c0_i32, %c0_i32_0 : i32, i32
  }
  func.func @transform_5(%arg0: i32) -> (i32, i32) {
    %c0_i32 = arith.constant 0 : i32
    %c0_i32_0 = arith.constant 0 : i32
    %c0_i32_1 = arith.constant 0 : i32
    return %c0_i32, %c0_i32_0 : i32, i32
  }
  func.func @transform_6(%arg0: i32) -> (i32, i32) {
    %c0_i32 = arith.constant 0 : i32
    %c0_i32_0 = arith.constant 0 : i32
    %c0_i32_1 = arith.constant 0 : i32
    return %c0_i32, %c0_i32_0 : i32, i32
  }
  func.func @transform_7(%arg0: i32) -> (i32, i32, i32) {
    %c0_i32 = arith.constant 0 : i32
    %c0_i32_0 = arith.constant 0 : i32
    %c0_i32_1 = arith.constant 0 : i32
    return %c0_i32, %arg0, %c0_i32_0 : i32, i32, i32
  }
}

</mosaic_0001>

<bundles_post_ra>
// kernel: _mog_fused.1
= control target key start
LH: loop header
LB: loop body
LE: loop exit
PB: predicated region body
PF: predicated region fallthrough
CT: control target
= control target key end

     0   :  { %12 = vsyncpa [#allocation3], 0  ;;  %s511_s0 = inlined_call_operand.hbm [shape: f32[8,16], index: 0, kind: input, shape index: {}]   ;;  %s512_s1 = inlined_call_operand.hbm [shape: f32[16,32], index: 1, kind: input, shape index: {}]   ;;  %s513_s2 = inlined_call_operand.vmem [shape: f32[1,32], index: 2, kind: input, shape index: {}]   ;;  %s514_s3 = inlined_call_operand.hbm [shape: f32[32,32], index: 3, kind: input, shape index: {}]   ;;  %s515_s4 = inlined_call_operand.vmem [shape: f32[1,32], index: 4, kind: input, shape index: {}]   ;;  %s516_s5 = inlined_call_operand.hbm [shape: f32[32,128], index: 5, kind: input, shape index: {}]   ;;  %s517_s6 = inlined_call_operand.vmem [shape: f32[1,128], index: 6, kind: input, shape index: {}]   ;;  %s518_s7 = inlined_call_operand.hbm [shape: f32[2,8,128], index: 7, kind: output, shape index: {}]  }
   0x1   :  { %13 = vsyncpa [#allocation6], 0 }
   0x2   :  { %14 = vsyncpa [#allocation9], 0  ;;  %s31_s26 = sshll.u32 %s512_s1, 4  ;;  %s32_s26 = int_to_ptr.hbm [resolvable:$true] %s31_s26 }
   0x3   :  { %15 = vsyncpa [#allocation4], 0  ;;  %s414_s27 = smov [#allocation5]   ;;  %s21_s8 = sshll.u32 %s511_s0, 4  ;;  %s22_s8 = int_to_ptr.hbm [resolvable:$true] %s21_s8 }
   0x4   :  { %s33_s28 = sshll.u32 %s414_s27, 4  ;;  %s415_s9 = smov 128   ;;  %s34_s28 = int_to_ptr.vmem [resolvable:$true] %s33_s28 }
   0x5   :  { %s416_s10 = smov 8   ;;  %s417_s11 = smov [#allocation2]  }
   0x6   :  { %39 = dma.hbm_to_vmem [thread:$0]  %s32_s26, 256, %s34_s28, [#allocation6], %s415_s9, %s415_s9, %s416_s10  }
   0x7   :  { %s23_s12 = sshll.u32 %s417_s11, 4  ;;  %s46_s14 = sshll.u32 %s514_s3, 4  ;;  %s24_s12 = int_to_ptr.vmem [resolvable:$true] %s23_s12  ;;  %s47_s14 = int_to_ptr.hbm [resolvable:$true] %s46_s14 }
   0x8   :  { %26 = dma.hbm_to_vmem [thread:$0]  %s22_s8, 128, %s24_s12, [#allocation3]  }
   0x9   :  { %s61_s0 = sshll.u32 %s516_s5, 4  ;;  %s418_s17 = smov [#allocation7]   ;;  %s62_s0 = int_to_ptr.hbm [resolvable:$true] %s61_s0 }
   0xa   :  { %s48_s18 = sshll.u32 %s418_s17, 4  ;;  %s419_s19 = smov [#allocation8]   ;;  %s49_s18 = int_to_ptr.vmem [resolvable:$true] %s48_s18 }
   0xb   :  { %54 = dma.hbm_to_vmem [thread:$0]  %s47_s14, 512, %s49_s18, [#allocation6], %s415_s9, %s415_s9, %s416_s10  }
   0xc   :  { %s63_s20 = sshll.u32 %s419_s19, 4  ;;  %s64_s20 = int_to_ptr.vmem [resolvable:$true] %s63_s20 }
   0xd   :  { %69 = dma.hbm_to_vmem [thread:$0]  %s62_s0, 512, %s64_s20, [#allocation9], %s415_s9, %s415_s9, %s416_s10  }
   0xe   :  { %406 = dma.done.wait [#allocation3], 128  }
   0xf   :  { %407 = vsyncadd [#allocation3], 4294967168 }
  0x10   :  { %408 = dma.done.wait [#allocation6], 768  }
  0x11   :  { %409 = vsyncadd [#allocation6], 4294966528 }
  0x12   :  { %410 = dma.done.wait [#allocation9], 512  }
  0x13   :  { %411 = vsyncadd [#allocation9], 4294966784  ;;  %v90_v0 = vld [vmem:[#allocation5 + $0x8] sm:$0xff]  ;;  %v89_v1 = vld [vmem:[#allocation5] sm:$0xff]  ;;  %vm95_vm0 = vcmask 130048   ;;  %vm130_vm2 = vcmask 261120   ;;  %v188_v21 = vlaneseq }
  0x14   :  { %113 = vmatpush.msra.mxu0 %v90_v0  ;;  %v88_v2 = vld [vmem:[#allocation2] sm:$0xff]  ;;  %v125_v3 = vld [vmem:[#allocation7 + $0x18] sm:$0xff]  ;;  %v124_v4 = vld [vmem:[#allocation7 + $0x10] sm:$0xff]  ;;  %s250_s26 = sshll.u32 %s518_s7, 4  ;;  %s251_s26 = int_to_ptr.hbm [resolvable:$true] %s250_s26 }
  0x15   :  { %146 = vmatpush.msra.mxu1 %v125_v3  ;;  %v123_v5 = vld [vmem:[#allocation7 + $0x8] sm:$0xff]  ;;  %v122_v6 = vld [vmem:[#allocation7] sm:$0xff]  ;;  %v160_v7 = vld [vmem:[#allocation8 + $0x18] sm:$0xff]  ;;  %v189_v22 = vand.u32 127, %v188_v21 }
  0x16   :  { %114 = vmatpush.msra.mxu0 %v89_v1  ;;  %180 = vmatpush.msra.mxu2 %v160_v7  ;;  %v275_v8 = vld [vmem:[%s513_s2] ss:$0 sm:$0xff]  ;;  %v159_v13 = vld [vmem:[#allocation8 + $0x10] sm:$0xff]  ;;  %v157_v15 = vld [vmem:[#allocation8] sm:$0xff] }
  0x17   :  { %265 = vmatmul.msk.f32.vlgmr.msra.gmra.mxu0 %vm95_vm0, %v88_v2  ;;  %147 = vmatpush.msra.mxu1 %v124_v4  ;;  %v158_v14 = vld [vmem:[#allocation8 + $0x8] sm:$0xff]  ;;  %vm193_vm4 = vcmp.ge.s32.totalorder %v189_v22, 8  ;;  %vm194_vm5 = vcmp.lt.s32.totalorder %v189_v22, 12  ;;  %vm190_vm7 = vcmp.ge.s32.totalorder %v189_v22, 4  ;;  %vm191_vm8 = vcmp.lt.s32.totalorder %v189_v22, 8 }
  0x18   :  { %181 = vmatpush.msra.mxu2 %v159_v13  ;;  %v276_v16 = vld [vmem:[%s515_s4] ss:$0 sm:$0xff]  ;;  %vm491_vm6 = vmand %vm193_vm4, %vm194_vm5  ;;  %s420_s4 = smov [#allocation10]  }
  0x19   :  { %148 = vmatpush.msra.mxu1 %v123_v5  ;;  %v277_v23 = vld [vmem:[%s517_s6] ss:$0 sm:$0xff]  ;;  %vm497_vm11 = vmand %vm190_vm7, %vm191_vm8  ;;  %s248_s6 = sshll.u32 %s420_s4, 4  ;;  %s249_s6 = int_to_ptr.vmem [resolvable:$true] %s248_s6 }
  0x1a   :  { %182 = vmatpush.msra.mxu2 %v158_v14 }
  0x1b   :  { %149 = vmatpush.msra.mxu1 %v122_v6 }
  0x1c   :  { %183 = vmatpush.msra.mxu2 %v157_v15 }
  0x94   :  { %v116_v9 = vpop.f32.mrf.mxu0 }
  0x95   :  { %v117_v10 = vadd.f32 %v275_v8, %v116_v9 }
  0x97   :  { %v120_v11 = vmul.f32 0.01, %v117_v10  ;;  %vm119_vm1 = vcmp.gt.f32.partialorder %v117_v10, 0.0 }
  0x99   :  { %v121_v12 = vsel %vm119_vm1, %v117_v10, %v120_v11 }
  0x9a   :  { %266 = vmatmul.msk.f32.vlgmr.msra.gmra.mxu1 %vm130_vm2, %v121_v12 }
 0x117   :  { %v151_v17 = vpop.f32.mrf.mxu1 }
 0x118   :  { %v152_v18 = vadd.f32 %v276_v16, %v151_v17 }
 0x11a   :  { %v155_v19 = vmul.f32 0.01, %v152_v18  ;;  %vm154_vm3 = vcmp.gt.f32.partialorder %v152_v18, 0.0 }
 0x11c   :  { %v156_v20 = vsel %vm154_vm3, %v152_v18, %v155_v19 }
 0x11d   :  { %267 = vmatmul.msk.f32.vlgmr.msra.gmra.mxu2 %vm130_vm2, %v156_v20 }
 0x1a0   :  { %v185_v24 = vpop.f32.mrf.mxu2 }
 0x1a1   :  { %v186_v26 = vadd.f32 %v277_v23, %v185_v24 }
 0x1a3   :  { %v197_v27 = vmin.f32 %v186_v26, 20.0  ;;  %241 = vst [vmem:[#allocation10] sm:$0xff] %v186_v26  ;;  %v213_v28 = vsel %vm491_vm6, %v186_v26, -inf  ;;  %vm196_vm10 = vcmp.gt.f32.partialorder %v186_v26, 20.0 }
 0x1a4   :  { %214 = vmax.xlane.f32.xlu0 %v213_v28 }
 0x1a5   :  { %v198_v29 = vmul.f32 1.442695, %v197_v27 }
 0x1a7   :  { %278 = vpow2.f32 %v198_v29 }
 0x1ad   :  { %v279_v30 = vpop.eup %278 }
 0x1ae   :  { %v200_v31 = vadd.f32 1.0, %v279_v30  ;;  %v203_v32 = vmul.f32 -0.5, %v279_v30  ;;  %v206_v34 = vand.u32 2147483647, %v279_v30 }
 0x1b0   :  { %280 = vlog2.f32 %v200_v31  ;;  %v204_v33 = vadd.f32 1.0, %v203_v32  ;;  %vm207_vm9 = vcmp.lt.f32.partialorder %v206_v34, 0.0004427343 }
 0x1b2   :  { %v205_v37 = vmul.f32 %v279_v30, %v204_v33 }
 0x1b6   :  { %v281_v35 = vpop.eup %280 }
 0x1b7   :  { %v202_v36 = vmul.f32 0.6931472, %v281_v35 }
 0x1b9   :  { %v208_v38 = vsel %vm207_vm9, %v205_v37, %v202_v36 }
 0x1ba   :  { %v209_v40 = vsel %vm196_vm10, %v186_v26, %v208_v38 }
 0x1bb   :  { %v210_v41 = vadd.f32 1e-06, %v209_v40 }
 0x1bd   :  { %v239_v42 = vsel %vm497_vm11, %v210_v41, %v186_v26 }
 0x217   :  { %v215_v43 = vpop.xlane.xlu0 %214 }
 0x218   :  { %v216_v44 = vsub.f32 %v213_v28, %v215_v43 }
 0x21a   :  { %v217_v45 = vmul.f32 1.442695, %v216_v44 }
 0x21c   :  { %282 = vpow2.f32 %v217_v45 }
 0x222   :  { %v283_v46 = vpop.eup %282 }
 0x223   :  { %219 = vadd.xlane.f32.xlu0 %v283_v46 }
 0x296   :  { %v220_v47 = vpop.xlane.xlu0 %219 }
 0x297   :  { %284 = vrcp.f32 %v220_v47  ;;  %v232_v51 = vand.u32 2147483648, %v220_v47  ;;  %v230_v53 = vand.u32 2147483647, %v220_v47  ;;  %vm226_vm13 = vweird.f32 %v220_v47 }
 0x299   :  { %v233_v55 = vor.u32 1.1754944e-38, %v232_v51  ;;  %vm231_vm15 = vcmp.eq.f32.partialorder %v230_v53, 8.507059e+37 }
 0x29d   :  { %v285_v48 = vpop.eup %284 }
 0x29e   :  { %v222_v49 = vmul.f32 %v285_v48, %v220_v47  ;;  %vm227_vm12 = vweird.f32 %v285_v48 }
 0x29f   :  { %vm228_vm14 = vmor %vm226_vm13, %vm227_vm12 }
 0x2a0   :  { %v223_v50 = vsub.f32 1.0, %v222_v49 }
 0x2a2   :  { %v224_v52 = vmul.f32 %v285_v48, %v223_v50 }
 0x2a4   :  { %v225_v54 = vadd.f32 %v285_v48, %v224_v52 }
 0x2a6   :  { %v229_v56 = vsel %vm228_vm14, %v285_v48, %v225_v54 }
 0x2a7   :  { %v234_v57 = vsel %vm231_vm15, %v233_v55, %v229_v56 }
 0x2a8   :  { %v235_v58 = vmul.f32 %v283_v46, %v234_v57 }
 0x2aa   :  { %v236_v59 = vmax.f32 %v235_v58, 1e-06 }
 0x2ac   :  { %v240_v60 = vsel %vm491_vm6, %v236_v59, %v239_v42 }
 0x2ad   :  { %243 = vst [vmem:[#allocation10 + $0x8] sm:$0xff] %v240_v60 }
 0x2ae   :  { %256 = dma.vmem_to_hbm [thread:$0]  %s249_s6, 256, %s251_s26, [#allocation4], %s415_s9, %s415_s9, %s416_s10  }
 0x2af   :  { %412 = dma.done.wait [#allocation4], 256  }
 0x2b0   :  { %413 = vsyncadd [#allocation4], 4294967040 }
 0x2b1   :  { %261 = vsyncpa [#allocation3], 1 }
 0x2b2   :  { %262 = vsyncpa [#allocation6], 1 }
 0x2b3   :  { %263 = vsyncpa [#allocation9], 1 }
 0x2b4   :  { %264 = vsyncpa [#allocation4], 1 }

// kernel: _mog_fused.1
= control target key start
LH: loop header
LB: loop body
LE: loop exit
PB: predicated region body
PF: predicated region fallthrough
CT: control target
= control target key end

     0   :  { %12 = vsyncpa [#allocation3], 0  ;;  %s511_s0 = inlined_call_operand.hbm [shape: f32[8,16], index: 0, kind: input, shape index: {}]   ;;  %s512_s1 = inlined_call_operand.hbm [shape: f32[16,32], index: 1, kind: input, shape index: {}]   ;;  %s513_s2 = inlined_call_operand.vmem [shape: f32[1,32], index: 2, kind: input, shape index: {}]   ;;  %s514_s3 = inlined_call_operand.hbm [shape: f32[32,32], index: 3, kind: input, shape index: {}]   ;;  %s515_s4 = inlined_call_operand.vmem [shape: f32[1,32], index: 4, kind: input, shape index: {}]   ;;  %s516_s5 = inlined_call_operand.hbm [shape: f32[32,128], index: 5, kind: input, shape index: {}]   ;;  %s517_s6 = inlined_call_operand.vmem [shape: f32[1,128], index: 6, kind: input, shape index: {}]   ;;  %s518_s7 = inlined_call_operand.hbm [shape: f32[2,8,128], index: 7, kind: output, shape index: {}]  }
   0x1   :  { %13 = vsyncpa [#allocation6], 0 }
   0x2   :  { %14 = vsyncpa [#allocation9], 0  ;;  %s31_s26 = sshll.u32 %s512_s1, 4  ;;  %s32_s26 = int_to_ptr.hbm [resolvable:$true] %s31_s26 }
   0x3   :  { %15 = vsyncpa [#allocation4], 0  ;;  %s414_s27 = smov [#allocation5]   ;;  %s21_s8 = sshll.u32 %s511_s0, 4  ;;  %s22_s8 = int_to_ptr.hbm [resolvable:$true] %s21_s8 }
   0x4   :  { %s33_s28 = sshll.u32 %s414_s27, 4  ;;  %s415_s9 = smov 128   ;;  %s34_s28 = int_to_ptr.vmem [resolvable:$true] %s33_s28 }
   0x5   :  { %s416_s10 = smov 8   ;;  %s417_s11 = smov [#allocation2]  }
   0x6   :  { %39 = dma.hbm_to_vmem [thread:$0]  %s32_s26, 256, %s34_s28, [#allocation6], %s415_s9, %s415_s9, %s416_s10  }
   0x7   :  { %s23_s12 = sshll.u32 %s417_s11, 4  ;;  %s46_s14 = sshll.u32 %s514_s3, 4  ;;  %s24_s12 = int_to_ptr.vmem [resolvable:$true] %s23_s12  ;;  %s47_s14 = int_to_ptr.hbm [resolvable:$true] %s46_s14 }
   0x8   :  { %26 = dma.hbm_to_vmem [thread:$0]  %s22_s8, 128, %s24_s12, [#allocation3]  }
   0x9   :  { %s61_s0 = sshll.u32 %s516_s5, 4  ;;  %s418_s17 = smov [#allocation7]   ;;  %s62_s0 = int_to_ptr.hbm [resolvable:$true] %s61_s0 }
   0xa   :  { %s48_s18 = sshll.u32 %s418_s17, 4  ;;  %s419_s19 = smov [#allocation8]   ;;  %s49_s18 = int_to_ptr.vmem [resolvable:$true] %s48_s18 }
   0xb   :  { %54 = dma.hbm_to_vmem [thread:$0]  %s47_s14, 512, %s49_s18, [#allocation6], %s415_s9, %s415_s9, %s416_s10  }
   0xc   :  { %s63_s20 = sshll.u32 %s419_s19, 4  ;;  %s64_s20 = int_to_ptr.vmem [resolvable:$true] %s63_s20 }
   0xd   :  { %69 = dma.hbm_to_vmem [thread:$0]  %s62_s0, 512, %s64_s20, [#allocation9], %s415_s9, %s415_s9, %s416_s10  }
   0xe   :  { %406 = dma.done.wait [#allocation3], 128  }
   0xf   :  { %407 = vsyncadd [#allocation3], 4294967168 }
  0x10   :  { %408 = dma.done.wait [#allocation6], 768  }
  0x11   :  { %409 = vsyncadd [#allocation6], 4294966528 }
  0x12   :  { %410 = dma.done.wait [#allocation9], 512  }
  0x13   :  { %411 = vsyncadd [#allocation9], 4294966784  ;;  %v90_v0 = vld [vmem:[#allocation5 + $0x8] sm:$0xff]  ;;  %v89_v1 = vld [vmem:[#allocation5] sm:$0xff]  ;;  %vm95_vm0 = vcmask 130048   ;;  %vm130_vm2 = vcmask 261120   ;;  %v188_v21 = vlaneseq }
  0x14   :  { %113 = vmatpush.msra.mxu0 %v90_v0  ;;  %v88_v2 = vld [vmem:[#allocation2] sm:$0xff]  ;;  %v125_v3 = vld [vmem:[#allocation7 + $0x18] sm:$0xff]  ;;  %v124_v4 = vld [vmem:[#allocation7 + $0x10] sm:$0xff]  ;;  %s250_s26 = sshll.u32 %s518_s7, 4  ;;  %s251_s26 = int_to_ptr.hbm [resolvable:$true] %s250_s26 }
  0x15   :  { %146 = vmatpush.msra.mxu1 %v125_v3  ;;  %v123_v5 = vld [vmem:[#allocation7 + $0x8] sm:$0xff]  ;;  %v122_v6 = vld [vmem:[#allocation7] sm:$0xff]  ;;  %v160_v7 = vld [vmem:[#allocation8 + $0x18] sm:$0xff]  ;;  %v189_v22 = vand.u32 127, %v188_v21 }
  0x16   :  { %114 = vmatpush.msra.mxu0 %v89_v1  ;;  %180 = vmatpush.msra.mxu2 %v160_v7  ;;  %v275_v8 = vld [vmem:[%s513_s2] ss:$0 sm:$0xff]  ;;  %v159_v13 = vld [vmem:[#allocation8 + $0x10] sm:$0xff]  ;;  %v157_v15 = vld [vmem:[#allocation8] sm:$0xff] }
  0x17   :  { %265 = vmatmul.msk.f32.vlgmr.msra.gmra.mxu0 %vm95_vm0, %v88_v2  ;;  %147 = vmatpush.msra.mxu1 %v124_v4  ;;  %v158_v14 = vld [vmem:[#allocation8 + $0x8] sm:$0xff]  ;;  %vm193_vm4 = vcmp.ge.s32.totalorder %v189_v22, 8  ;;  %vm194_vm5 = vcmp.lt.s32.totalorder %v189_v22, 12  ;;  %vm190_vm7 = vcmp.ge.s32.totalorder %v189_v22, 4  ;;  %vm191_vm8 = vcmp.lt.s32.totalorder %v189_v22, 8 }
  0x18   :  { %181 = vmatpush.msra.mxu2 %v159_v13  ;;  %v276_v16 = vld [vmem:[%s515_s4] ss:$0 sm:$0xff]  ;;  %vm491_vm6 = vmand %vm193_vm4, %vm194_vm5  ;;  %s420_s4 = smov [#allocation10]  }
  0x19   :  { %148 = vmatpush.msra.mxu1 %v123_v5  ;;  %v277_v23 = vld [vmem:[%s517_s6] ss:$0 sm:$0xff]  ;;  %vm497_vm11 = vmand %vm190_vm7, %vm191_vm8  ;;  %s248_s6 = sshll.u32 %s420_s4, 4  ;;  %s249_s6 = int_to_ptr.vmem [resolvable:$true] %s248_s6 }
  0x1a   :  { %182 = vmatpush.msra.mxu2 %v158_v14 }
  0x1b   :  { %149 = vmatpush.msra.mxu1 %v122_v6 }
  0x1c   :  { %183 = vmatpush.msra.mxu2 %v157_v15 }
  0x94   :  { %v116_v9 = vpop.f32.mrf.mxu0 }
  0x95   :  { %v117_v10 = vadd.f32 %v275_v8, %v116_v9 }
  0x97   :  { %v120_v11 = vmul.f32 0.01, %v117_v10  ;;  %vm119_vm1 = vcmp.gt.f32.partialorder %v117_v10, 0.0 }
  0x99   :  { %v121_v12 = vsel %vm119_vm1, %v117_v10, %v120_v11 }
  0x9a   :  { %266 = vmatmul.msk.f32.vlgmr.msra.gmra.mxu1 %vm130_vm2, %v121_v12 }
 0x117   :  { %v151_v17 = vpop.f32.mrf.mxu1 }
 0x118   :  { %v152_v18 = vadd.f32 %v276_v16, %v151_v17 }
 0x11a   :  { %v155_v19 = vmul.f32 0.01, %v152_v18  ;;  %vm154_vm3 = vcmp.gt.f32.partialorder %v152_v18, 0.0 }
 0x11c   :  { %v156_v20 = vsel %vm154_vm3, %v152_v18, %v155_v19 }
 0x11d   :  { %267 = vmatmul.msk.f32.vlgmr.msra.gmra.mxu2 %vm130_vm2, %v156_v20 }
 0x1a0   :  { %v185_v24 = vpop.f32.mrf.mxu2 }
 0x1a1   :  { %v186_v26 = vadd.f32 %v277_v23, %v185_v24 }
 0x1a3   :  { %v197_v27 = vmin.f32 %v186_v26, 20.0  ;;  %241 = vst [vmem:[#allocation10] sm:$0xff] %v186_v26  ;;  %v213_v28 = vsel %vm491_vm6, %v186_v26, -inf  ;;  %vm196_vm10 = vcmp.gt.f32.partialorder %v186_v26, 20.0 }
 0x1a4   :  { %214 = vmax.xlane.f32.xlu0 %v213_v28 }
 0x1a5   :  { %v198_v29 = vmul.f32 1.442695, %v197_v27 }
 0x1a7   :  { %278 = vpow2.f32 %v198_v29 }
 0x1ad   :  { %v279_v30 = vpop.eup %278 }
 0x1ae   :  { %v200_v31 = vadd.f32 1.0, %v279_v30  ;;  %v203_v32 = vmul.f32 -0.5, %v279_v30  ;;  %v206_v34 = vand.u32 2147483647, %v279_v30 }
 0x1b0   :  { %280 = vlog2.f32 %v200_v31  ;;  %v204_v33 = vadd.f32 1.0, %v203_v32  ;;  %vm207_vm9 = vcmp.lt.f32.partialorder %v206_v34, 0.0004427343 }
 0x1b2   :  { %v205_v37 = vmul.f32 %v279_v30, %v204_v33 }
 0x1b6   :  { %v281_v35 = vpop.eup %280 }
 0x1b7   :  { %v202_v36 = vmul.f32 0.6931472, %v281_v35 }
 0x1b9   :  { %v208_v38 = vsel %vm207_vm9, %v205_v37, %v202_v36 }
 0x1ba   :  { %v209_v40 = vsel %vm196_vm10, %v186_v26, %v208_v38 }
 0x1bb   :  { %v210_v41 = vadd.f32 1e-06, %v209_v40 }
 0x1bd   :  { %v239_v42 = vsel %vm497_vm11, %v210_v41, %v186_v26 }
 0x217   :  { %v215_v43 = vpop.xlane.xlu0 %214 }
 0x218   :  { %v216_v44 = vsub.f32 %v213_v28, %v215_v43 }
 0x21a   :  { %v217_v45 = vmul.f32 1.442695, %v216_v44 }
 0x21c   :  { %282 = vpow2.f32 %v217_v45 }
 0x222   :  { %v283_v46 = vpop.eup %282 }
 0x223   :  { %219 = vadd.xlane.f32.xlu0 %v283_v46 }
 0x296   :  { %v220_v47 = vpop.xlane.xlu0 %219 }
 0x297   :  { %284 = vrcp.f32 %v220_v47  ;;  %v232_v51 = vand.u32 2147483648, %v220_v47  ;;  %v230_v53 = vand.u32 2147483647, %v220_v47  ;;  %vm226_vm13 = vweird.f32 %v220_v47 }
 0x299   :  { %v233_v55 = vor.u32 1.1754944e-38, %v232_v51  ;;  %vm231_vm15 = vcmp.eq.f32.partialorder %v230_v53, 8.507059e+37 }
 0x29d   :  { %v285_v48 = vpop.eup %284 }
 0x29e   :  { %v222_v49 = vmul.f32 %v285_v48, %v220_v47  ;;  %vm227_vm12 = vweird.f32 %v285_v48 }
 0x29f   :  { %vm228_vm14 = vmor %vm226_vm13, %vm227_vm12 }
 0x2a0   :  { %v223_v50 = vsub.f32 1.0, %v222_v49 }
 0x2a2   :  { %v224_v52 = vmul.f32 %v285_v48, %v223_v50 }
 0x2a4   :  { %v225_v54 = vadd.f32 %v285_v48, %v224_v52 }
 0x2a6   :  { %v229_v56 = vsel %vm228_vm14, %v285_v48, %v225_v54 }
 0x2a7   :  { %v234_v57 = vsel %vm231_vm15, %v233_v55, %v229_v56 }
 0x2a8   :  { %v235_v58 = vmul.f32 %v283_v46, %v234_v57 }
 0x2aa   :  { %v236_v59 = vmax.f32 %v235_v58, 1e-06 }
 0x2ac   :  { %v240_v60 = vsel %vm491_vm6, %v236_v59, %v239_v42 }
 0x2ad   :  { %243 = vst [vmem:[#allocation10 + $0x8] sm:$0xff] %v240_v60 }
 0x2ae   :  { %256 = dma.vmem_to_hbm [thread:$0]  %s249_s6, 256, %s251_s26, [#allocation4], %s415_s9, %s415_s9, %s416_s10  }
 0x2af   :  { %412 = dma.done.wait [#allocation4], 256  }
 0x2b0   :  { %413 = vsyncadd [#allocation4], 4294967040 }
 0x2b1   :  { %261 = vsyncpa [#allocation3], 1 }
 0x2b2   :  { %262 = vsyncpa [#allocation6], 1 }
 0x2b3   :  { %263 = vsyncpa [#allocation9], 1 }
 0x2b4   :  { %264 = vsyncpa [#allocation4], 1 }

</bundles_post_ra>
